<compile_context>
chip_gen: v7x
topology: tpu7x:2x2x1
jax: 0.10.0
libtpu: 0.0.40
codegen_flags: <defaults>
</compile_context>

<pallas_src>
import functools

import jax
import jax.numpy as jnp
from jax.experimental import pallas as pl
from jax.experimental.pallas import tpu as pltpu


def _round_up(x, m):
    return (x + m - 1) // m * m


def _sublane(dtype):
    """Dtype-native sublane tile: 8 for f32, 16 for bf16, 32 for int8/fp8."""
    return max(8, 32 // jnp.dtype(dtype).itemsize)


def _pad2d(a, rows, cols):
    r, c = a.shape
    return jnp.pad(a, ((0, rows - r), (0, cols - c)))


def _fused_mlp_kernel(x_ref, *refs, num_layers):
    """Whole MLP in one kernel: chained (ReLU ->) Linear, f32 accumulation.

    refs = (w0, b0, w1, b1, ..., w_{L-1}, b_{L-1}, o_ref); everything is a
    full lane-padded VMEM block.
    """
    o_ref = refs[-1]
    compute_dtype = x_ref.dtype
    h = x_ref[...]
    for l in range(num_layers):
        w_ref = refs[2 * l]
        b_ref = refs[2 * l + 1]
        if l != 0:
            # PyTorch Sequential ordering for layers > 0: ReLU -> Dropout -> Linear.
            h = jnp.maximum(h, 0)
            # TODO(synk): training-mode Dropout (pltpu.prng_seed + prng_random_bits
            # mask with 1/(1-p) scaling in this f32 epilogue) not implemented;
            # eval-mode Dropout is the identity.
        acc = jnp.dot(h, w_ref[...], preferred_element_type=jnp.float32)
        acc = acc + b_ref[...].astype(jnp.float32)   # (1, N) broadcasts over M
        if l == num_layers - 1:
            h = acc                                  # keep final result in f32
        else:
            h = acc.astype(compute_dtype)            # feed next MXU in model dtype
    o_ref[...] = h.astype(o_ref.dtype)


def prepare_mlp_params(params, compute_dtype=jnp.float32):
    """Pad (lane multiples of 128) and cast weights/biases ONCE, outside forward.

    params: list of (w (K,N), b (1,N)).  Returns (padded_flat, sizes, sizes_pad).
    """
    sizes = tuple([params[0][0].shape[0]] + [w.shape[1] for w, _ in params])
    sizes_pad = tuple(_round_up(s, 128) for s in sizes)
    padded = []
    for l, (w, b) in enumerate(params):
        kp, np_ = sizes_pad[l], sizes_pad[l + 1]
        padded.append(_pad2d(w, kp, np_).astype(compute_dtype))
        padded.append(_pad2d(b.reshape(1, -1), 1, np_).astype(compute_dtype))
    return tuple(padded), sizes, sizes_pad


def fused_mlp(x2d, padded_params, sizes, sizes_pad, *, tile_m=512, out_dtype=None):
    """y = MLP(x2d) with all layers fused into one Pallas kernel."""
    M, K = x2d.shape
    assert K == sizes[0], (K, sizes)
    num_layers = len(padded_params) // 2
    compute_dtype = padded_params[0].dtype
    out_dtype = out_dtype or x2d.dtype

    # Batch tiling: dtype-native sublane rounding; split into >= 2 parallel
    # blocks when possible so v7x's 2 TensorCores both get work; cap at tile_m.
    sub = _sublane(compute_dtype)
    tile_m = _round_up(tile_m, sub)
    if M <= sub:
        tm = sub
        m_pad = sub
    elif M <= 2 * tile_m:
        tm = _round_up(pl.cdiv(M, 2), sub)
        m_pad = 2 * tm
    else:
        tm = tile_m
        m_pad = _round_up(M, tm)

    k_pad = sizes_pad[0]
    n_out, n_out_pad = sizes[-1], sizes_pad[-1]

    x_p = _pad2d(x2d.astype(compute_dtype), m_pad, k_pad)

    in_specs = [pl.BlockSpec((tm, k_pad), lambda i: (i, 0))]
    for l in range(num_layers):
        kp, np_ = sizes_pad[l], sizes_pad[l + 1]
        in_specs.append(pl.BlockSpec((kp, np_), lambda i: (0, 0)))
        in_specs.append(pl.BlockSpec((1, np_), lambda i: (0, 0)))

    itemsize = jnp.dtype(compute_dtype).itemsize
    param_bytes = sum(int(p.size) * itemsize for p in padded_params)
    flops = 2 * m_pad * sum(sizes_pad[l] * sizes_pad[l + 1] for l in range(num_layers))
    bytes_accessed = (m_pad * k_pad * itemsize + param_bytes
                      + m_pad * n_out_pad * jnp.dtype(out_dtype).itemsize)
    cost = pl.CostEstimate(flops=flops, transcendentals=0,
                           bytes_accessed=bytes_accessed)

    # VMEM budget: double-buffered x/out blocks + (double-buffered) resident
    # params + slack for chained-layer temporaries, clamped to the 32 MiB
    # default floor and the v7x 64 MiB physical ceiling.
    vmem_est = 2 * (tm * k_pad + tm * n_out_pad) * itemsize + 2 * param_bytes
    vmem_limit = int(min(64 * 1024 * 1024, max(2 * vmem_est, 32 * 1024 * 1024)))

    kernel = functools.partial(_fused_mlp_kernel, num_layers=num_layers)
    out_p = pl.pallas_call(
        kernel,
        out_shape=jax.ShapeDtypeStruct((m_pad, n_out_pad), out_dtype),
        grid_spec=pltpu.PrefetchScalarGridSpec(
            num_scalar_prefetch=0,
            grid=(m_pad // tm,),
            in_specs=in_specs,
            out_specs=pl.BlockSpec((tm, n_out_pad), lambda i: (i, 0)),
        ),
        compiler_params=pltpu.CompilerParams(
            # Batch tiles are independent -> "parallel" lets v7x's 2 TCs share them.
            dimension_semantics=("parallel",),
            vmem_limit_bytes=vmem_limit),
        cost_estimate=cost,
    )(x_p, *padded_params)

    return out_p[:M, :n_out]


@functools.partial(jax.jit, static_argnames=("sizes", "sizes_pad", "tile_m"))
def _mlp_forward_jit(x, padded_params, sizes, sizes_pad, tile_m):
    x2d = x.reshape(x.shape[0], -1)            # == torch.flatten(x, 1)
    return fused_mlp(x2d, padded_params, sizes, sizes_pad,
                     tile_m=tile_m, out_dtype=x.dtype)


def mlp_forward(x, prepared_params, dropout_p=0.5, tile_m=512):
    """flatten(x, 1) then the fused Linear / ReLU / (eval) Dropout stack.

    `prepared_params` comes from prepare_mlp_params(); padding/casting is done
    once there, not per forward call.  dropout_p: eval mode only (identity).
    """
    padded, sizes, sizes_pad = prepared_params
    return _mlp_forward_jit(x, padded, sizes, sizes_pad, tile_m)


def init_mlp_params(key, input_size, hidden_sizes, output_size,
                    dtype=jnp.float32):
    """Kaiming-uniform-ish init matching nn.Linear shapes (weights as W.T)."""
    all_sizes = [input_size] + list(hidden_sizes) + [output_size]
    params = []
    for s1, s2 in zip(all_sizes, all_sizes[1:]):
        key, kw, kb = jax.random.split(key, 3)
        bound = 1.0 / (s1 ** 0.5)
        w = jax.random.uniform(kw, (s1, s2), dtype, -bound, bound)
        b = jax.random.uniform(kb, (1, s2), dtype, -bound, bound)
        params.append((w, b))
    return params


if __name__ == "__main__":
    key = jax.random.PRNGKey(0)
    k_in, k_params = jax.random.split(key)

    batch, channels, height, width = 2, 4, 16, 16
    input_size = channels * height * width          # 1024
    hidden_sizes = (32, 32)
    output_size = 8

    x = jax.random.normal(k_in, (batch, channels, height, width), jnp.float32)
    params = init_mlp_params(k_params, input_size, hidden_sizes, output_size)

    # Pure-JAX reference (eval-mode Dropout = identity).
    ref = x.reshape(batch, -1)
    for idx, (w, b) in enumerate(params):
        if idx != 0:
            ref = jnp.maximum(ref, 0.0)
        ref = ref @ w + b

    # f32 compute path: strict match to the reference.
    prepped_f32 = prepare_mlp_params(params, compute_dtype=jnp.float32)
    out_f32 = jax.block_until_ready(mlp_forward(x, prepped_f32))
    assert out_f32.shape == (batch, output_size), out_f32.shape
    assert jnp.allclose(out_f32, ref, atol=1e-4, rtol=1e-4)

    # bf16 weight/activation path (native bf16 MXU, halved weight DMA) with
    # f32 accumulation: looser tolerance against the f32 reference.
    prepped_bf16 = prepare_mlp_params(params, compute_dtype=jnp.bfloat16)
    out_bf16 = jax.block_until_ready(mlp_forward(x, prepped_bf16))
    assert out_bf16.shape == (batch, output_size), out_bf16.shape
    assert jnp.allclose(out_bf16, ref, atol=5e-2, rtol=5e-2)

    print("KERNEL_OK")
</pallas_src>

<mosaic_0001>
module attributes {stable_mosaic.version = 11 : i64} {
  func.func @_fused_mlp_kernel(%arg0: i32, %arg1: memref<8x1024xf32, #tpu.memory_space<vmem>>, %arg2: memref<1024x128xf32, #tpu.memory_space<vmem>>, %arg3: memref<1x128xf32, #tpu.memory_space<vmem>>, %arg4: memref<128x128xf32, #tpu.memory_space<vmem>>, %arg5: memref<1x128xf32, #tpu.memory_space<vmem>>, %arg6: memref<128x128xf32, #tpu.memory_space<vmem>>, %arg7: memref<1x128xf32, #tpu.memory_space<vmem>>, %arg8: memref<8x128xf32, #tpu.memory_space<vmem>>) attributes {dimension_semantics = [#tpu.dimension_semantics<parallel>], iteration_bounds = array<i64: 1>, scalar_prefetch = 0 : i64, scratch_operands = 0 : i64, tpu.core_type = #tpu.core_type<tc>, window_params = [{transform_indices = @transform_0, window_bounds = array<i64: 8, 1024>}, {pipeline_mode = #tpu.pipeline_mode<synchronous>, transform_indices = @transform_1, window_bounds = array<i64: 1024, 128>}, {pipeline_mode = #tpu.pipeline_mode<synchronous>, transform_indices = @transform_2, window_bounds = array<i64: 1, 128>}, {pipeline_mode = #tpu.pipeline_mode<synchronous>, transform_indices = @transform_3, window_bounds = array<i64: 128, 128>}, {pipeline_mode = #tpu.pipeline_mode<synchronous>, transform_indices = @transform_4, window_bounds = array<i64: 1, 128>}, {pipeline_mode = #tpu.pipeline_mode<synchronous>, transform_indices = @transform_5, window_bounds = array<i64: 128, 128>}, {pipeline_mode = #tpu.pipeline_mode<synchronous>, transform_indices = @transform_6, window_bounds = array<i64: 1, 128>}, {transform_indices = @transform_7, window_bounds = array<i64: 8, 128>}]} {
    %c0 = arith.constant 0 : index
    %c0_0 = arith.constant 0 : index
    %0 = vector.load %arg1[%c0, %c0_0] : memref<8x1024xf32, #tpu.memory_space<vmem>>, vector<8x1024xf32>
    %c0_1 = arith.constant 0 : index
    %c0_2 = arith.constant 0 : index
    %1 = vector.load %arg2[%c0_1, %c0_2] : memref<1024x128xf32, #tpu.memory_space<vmem>>, vector<1024x128xf32>
    %cst = arith.constant dense<0.000000e+00> : vector<8x128xf32>
    %2 = tpu.matmul %0, %1, %cst {dimension_numbers = #tpu.dot_dimension_numbers<[1], [0], [0], [1], [0, 0, 1, 1], [], []>} : vector<8x1024xf32>, vector<1024x128xf32>, vector<8x128xf32> -> vector<8x128xf32>
    %c0_3 = arith.constant 0 : index
    %c0_4 = arith.constant 0 : index
    %3 = vector.load %arg3[%c0_3, %c0_4] : memref<1x128xf32, #tpu.memory_space<vmem>>, vector<1x128xf32>
    %4 = vector.broadcast %3 : vector<1x128xf32> to vector<8x128xf32>
    %5 = arith.addf %2, %4 : vector<8x128xf32>
    %cst_5 = arith.constant 0.000000e+00 : f32
    %6 = vector.broadcast %cst_5 : f32 to vector<8x128xf32>
    %7 = arith.maximumf %5, %6 : vector<8x128xf32>
    %c0_6 = arith.constant 0 : index
    %c0_7 = arith.constant 0 : index
    %8 = vector.load %arg4[%c0_6, %c0_7] : memref<128x128xf32, #tpu.memory_space<vmem>>, vector<128x128xf32>
    %cst_8 = arith.constant dense<0.000000e+00> : vector<8x128xf32>
    %9 = tpu.matmul %7, %8, %cst_8 {dimension_numbers = #tpu.dot_dimension_numbers<[1], [0], [0], [1], [0, 0, 1, 1], [], []>} : vector<8x128xf32>, vector<128x128xf32>, vector<8x128xf32> -> vector<8x128xf32>
    %c0_9 = arith.constant 0 : index
    %c0_10 = arith.constant 0 : index
    %10 = vector.load %arg5[%c0_9, %c0_10] : memref<1x128xf32, #tpu.memory_space<vmem>>, vector<1x128xf32>
    %11 = vector.broadcast %10 : vector<1x128xf32> to vector<8x128xf32>
    %12 = arith.addf %9, %11 : vector<8x128xf32>
    %cst_11 = arith.constant 0.000000e+00 : f32
    %13 = vector.broadcast %cst_11 : f32 to vector<8x128xf32>
    %14 = arith.maximumf %12, %13 : vector<8x128xf32>
    %c0_12 = arith.constant 0 : index
    %c0_13 = arith.constant 0 : index
    %15 = vector.load %arg6[%c0_12, %c0_13] : memref<128x128xf32, #tpu.memory_space<vmem>>, vector<128x128xf32>
    %cst_14 = arith.constant dense<0.000000e+00> : vector<8x128xf32>
    %16 = tpu.matmul %14, %15, %cst_14 {dimension_numbers = #tpu.dot_dimension_numbers<[1], [0], [0], [1], [0, 0, 1, 1], [], []>} : vector<8x128xf32>, vector<128x128xf32>, vector<8x128xf32> -> vector<8x128xf32>
    %c0_15 = arith.constant 0 : index
    %c0_16 = arith.constant 0 : index
    %17 = vector.load %arg7[%c0_15, %c0_16] : memref<1x128xf32, #tpu.memory_space<vmem>>, vector<1x128xf32>
    %18 = vector.broadcast %17 : vector<1x128xf32> to vector<8x128xf32>
    %19 = arith.addf %16, %18 : vector<8x128xf32>
    %c0_17 = arith.constant 0 : index
    %c0_18 = arith.constant 0 : index
    %20 = vector.load %arg8[%c0_17, %c0_18] : memref<8x128xf32, #tpu.memory_space<vmem>>, vector<8x128xf32>
    tpu.vector_store %arg8[%c0_17, %c0_18], %19 {strides = array<i32>} : memref<8x128xf32, #tpu.memory_space<vmem>>, vector<8x128xf32>,
    return
  }
  func.func @transform_0(%arg0: i32) -> (i32, i32) {
    %c0_i32 = arith.constant 0 : i32
    %c0_i32_0 = arith.constant 0 : i32
    return %arg0, %c0_i32 : i32, i32
  }
  func.func @transform_1(%arg0: i32) -> (i32, i32) {
    %c0_i32 = arith.constant 0 : i32
    %c0_i32_0 = arith.constant 0 : i32
    %c0_i32_1 = arith.constant 0 : i32
    return %c0_i32, %c0_i32_0 : i32, i32
  }
  func.func @transform_2(%arg0: i32) -> (i32, i32) {
    %c0_i32 = arith.constant 0 : i32
    %c0_i32_0 = arith.constant 0 : i32
    %c0_i32_1 = arith.constant 0 : i32
    return %c0_i32, %c0_i32_0 : i32, i32
  }
  func.func @transform_3(%arg0: i32) -> (i32, i32) {
    %c0_i32 = arith.constant 0 : i32
    %c0_i32_0 = arith.constant 0 : i32
    %c0_i32_1 = arith.constant 0 : i32
    return %c0_i32, %c0_i32_0 : i32, i32
  }
  func.func @transform_4(%arg0: i32) -> (i32, i32) {
    %c0_i32 = arith.constant 0 : i32
    %c0_i32_0 = arith.constant 0 : i32
    %c0_i32_1 = arith.constant 0 : i32
    return %c0_i32, %c0_i32_0 : i32, i32
  }
  func.func @transform_5(%arg0: i32) -> (i32, i32) {
    %c0_i32 = arith.constant 0 : i32
    %c0_i32_0 = arith.constant 0 : i32
    %c0_i32_1 = arith.constant 0 : i32
    return %c0_i32, %c0_i32_0 : i32, i32
  }
  func.func @transform_6(%arg0: i32) -> (i32, i32) {
    %c0_i32 = arith.constant 0 : i32
    %c0_i32_0 = arith.constant 0 : i32
    %c0_i32_1 = arith.constant 0 : i32
    return %c0_i32, %c0_i32_0 : i32, i32
  }
  func.func @transform_7(%arg0: i32) -> (i32, i32) {
    %c0_i32 = arith.constant 0 : i32
    %c0_i32_0 = arith.constant 0 : i32
    return %arg0, %c0_i32 : i32, i32
  }
}

</mosaic_0001>

<bundles_post_ra>
// kernel: _mlp_forward_jit.1
= control target key start
LH: loop header
LB: loop body
LE: loop exit
PB: predicated region body
PF: predicated region fallthrough
CT: control target
= control target key end

     0   :  { %12 = vsyncpa [#allocation3], 0  ;;  %s1321_s0 = inlined_call_operand.vmem [shape: f32[8,1024], index: 0, kind: input, shape index: {}]   ;;  %s1322_s1 = inlined_call_operand.hbm [shape: f32[1024,128], index: 1, kind: input, shape index: {}]   ;;  %s1323_s2 = inlined_call_operand.vmem [shape: f32[1,128], index: 2, kind: input, shape index: {}]   ;;  %s1324_s3 = inlined_call_operand.vmem [shape: f32[128,128], index: 3, kind: input, shape index: {}]   ;;  %s1325_s4 = inlined_call_operand.vmem [shape: f32[1,128], index: 4, kind: input, shape index: {}]   ;;  %s1326_s5 = inlined_call_operand.hbm [shape: f32[128,128], index: 5, kind: input, shape index: {}]   ;;  %s1327_s6 = inlined_call_operand.vmem [shape: f32[1,128], index: 6, kind: input, shape index: {}]   ;;  %s1328_s7 = inlined_call_operand.vmem [shape: f32[8,128], index: 7, kind: output, shape index: {}]  }
   0x1   :  { %13 = vsyncpa [#allocation5], 0  ;;  %s1150_s24 = smov [#allocation2]   ;;  %s1102_s28 = scalar_lea.hbm %s1322_s1, 16384 }
   0x2   :  { %s21_s25 = sshll.u32 %s1150_s24, 4  ;;  %p1103_p0 = scmp.ne.s32.totalorder %s1322_s1, %s1102_s28  ;;  %s22_s25 = int_to_ptr.vmem [resolvable:$true] %s21_s25 }
   0x3   :  { %p1106_p1 = scmp.lt.u32.totalorder %s1102_s28, %s1322_s1 }
   0x5   :  { %p1108_p2 = pnand %p1106_p1, %p1103_p0 }
   0x7   :  { %1111 = shalt.err (!%p1108_p2)
}
   0x8   :  { %s1112_s10 = scalar_lea.vmem %s22_s25, 16384  ;;  %p1117_p4 = scmp.lt.s32.totalorder %s22_s25, %s22_s25 }
   0x9   :  { %p1113_p3 = scmp.ne.s32.totalorder %s22_s25, %s1112_s10  ;;  %p1118_p5 = scmp.lt.s32.totalorder %s1112_s10, %s1112_s10 }
   0xb   :  { %p1119_p6 = por %p1118_p5, %p1117_p4 }
   0xd   :  { %p1120_p7 = pnand %p1119_p6, %p1113_p3 }
   0xf   :  { %1123 = shalt.err (!%p1120_p7)
}
  0x10   :  { %s1151_s11 = smov 128   ;;  %s1152_s12 = smov 8  }
  0x11   :  { %27 = dma.hbm_to_vmem [thread:$0]  %s1322_s1, 16384, %s22_s25, [#allocation3], %s1151_s11, %s1151_s11, %s1152_s12  }
  0x12   :  { %s1153_s15 = smov [#allocation4]   ;;  %s1124_s19 = scalar_lea.hbm %s1326_s5, 2048 }
  0x13   :  { %s39_s16 = sshll.u32 %s1153_s15, 4  ;;  %p1125_p8 = scmp.ne.s32.totalorder %s1326_s5, %s1124_s19  ;;  %s40_s16 = int_to_ptr.vmem [resolvable:$true] %s39_s16 }
  0x14   :  { %p1128_p9 = scmp.lt.u32.totalorder %s1124_s19, %s1326_s5 }
  0x16   :  { %p1130_p10 = pnand %p1128_p9, %p1125_p8 }
  0x18   :  { %1133 = shalt.err (!%p1130_p10)
}
  0x19   :  { %s1134_s24 = scalar_lea.vmem %s40_s16, 2048  ;;  %p1139_p12 = scmp.lt.s32.totalorder %s40_s16, %s40_s16 }
  0x1a   :  { %p1135_p11 = scmp.ne.s32.totalorder %s40_s16, %s1134_s24  ;;  %p1140_p13 = scmp.lt.s32.totalorder %s1134_s24, %s1134_s24 }
  0x1c   :  { %p1141_p0 = por %p1140_p13, %p1139_p12 }
  0x1e   :  { %p1142_p1 = pnand %p1141_p0, %p1135_p11 }
  0x20   :  { %1145 = shalt.err (!%p1142_p1)
}
  0x21   :  { %45 = dma.hbm_to_vmem [thread:$0]  %s1326_s5, 2048, %s40_s16, [#allocation5], %s1151_s11, %s1151_s11, %s1152_s12  }
  0x22   :  { %1146 = dma.done.wait [#allocation3], 16384  }
  0x23   :  { %1147 = vsyncadd [#allocation3], 4294950912 }
  0x24   :  { %1148 = dma.done.wait [#allocation5], 2048  }
  0x25   :  { %1149 = vsyncadd [#allocation5], 4294965248  ;;  %v78_v0 = vld [vmem:[#allocation2 + $0x80] sm:$0xff]  ;;  %v79_v1 = vld [vmem:[#allocation2 + $0x88] sm:$0xff]  ;;  %vm1155_vm0 = vmmov 0  }
  0x26   :  { %v62_v2 = vld [vmem:[#allocation2] sm:$0xff]  ;;  %v919_v3 = vpack.c.bf16 %v79_v1, %v78_v0  ;;  %v63_v4 = vld [vmem:[#allocation2 + $0x8] sm:$0xff]  ;;  %v80_v11 = vld [vmem:[#allocation2 + $0x90] sm:$0xff] }
  0x27   :  { %v110_v5 = vld [vmem:[#allocation2 + $0x180] sm:$0xff]  ;;  %v111_v6 = vld [vmem:[#allocation2 + $0x188] sm:$0xff]  ;;  %v921_v7 = vpack.c.bf16 %v63_v4, %v62_v2  ;;  %v81_v13 = vld [vmem:[#allocation2 + $0x98] sm:$0xff] }
  0x28   :  { %v951_v8 = vpack.c.bf16 %v111_v6, %v110_v5  ;;  %v94_v9 = vld [vmem:[#allocation2 + $0x100] sm:$0xff]  ;;  %v95_v10 = vld [vmem:[#allocation2 + $0x108] sm:$0xff]  ;;  %920 = vmatprep.subr.bf16.mxu0 %v919_v3  ;;  %v64_v14 = vld [vmem:[#allocation2 + $0x10] sm:$0xff]  ;;  %v923_v16 = vpack.c.bf16 %v81_v13, %v80_v11 }
  0x29   :  { %v953_v12 = vpack.c.bf16 %v95_v10, %v94_v9  ;;  %v65_v15 = vld [vmem:[#allocation2 + $0x18] sm:$0xff]  ;;  %922 = vmatpush3.bf16.msra.mxu0 %v921_v7  ;;  %v112_v18 = vld [vmem:[#allocation2 + $0x190] sm:$0xff]  ;;  %v82_v23 = vld [vmem:[#allocation2 + $0xa0] sm:$0xff] }
  0x2a   :  { %952 = vmatprep.subr.bf16.mxu1 %v951_v8  ;;  %v925_v17 = vpack.c.bf16 %v65_v15, %v64_v14  ;;  %v113_v19 = vld [vmem:[#allocation2 + $0x198] sm:$0xff]  ;;  %v96_v20 = vld [vmem:[#allocation2 + $0x110] sm:$0xff]  ;;  %v83_v24 = vld [vmem:[#allocation2 + $0xa8] sm:$0xff]  ;;  %924 = vmatprep.subr.bf16.mxu0 %v923_v16 }
  0x2b   :  { %954 = vmatpush3.bf16.msra.mxu1 %v953_v12  ;;  %v955_v21 = vpack.c.bf16 %v113_v19, %v112_v18  ;;  %v97_v22 = vld [vmem:[#allocation2 + $0x118] sm:$0xff]  ;;  %v927_v26 = vpack.c.bf16 %v83_v24, %v82_v23  ;;  %v66_v27 = vld [vmem:[#allocation2 + $0x20] sm:$0xff]  ;;  %v67_v28 = vld [vmem:[#allocation2 + $0x28] sm:$0xff] }
  0x2c   :  { %v957_v25 = vpack.c.bf16 %v97_v22, %v96_v20  ;;  %v114_v29 = vld [vmem:[#allocation2 + $0x1a0] sm:$0xff]  ;;  %v115_v30 = vld [vmem:[#allocation2 + $0x1a8] sm:$0xff]  ;;  %v929_v33 = vpack.c.bf16 %v67_v28, %v66_v27  ;;  %v84_v35 = vld [vmem:[#allocation2 + $0xb0] sm:$0xff] }
  0x2d   :  { %956 = vmatprep.subr.bf16.mxu1 %v955_v21  ;;  %v98_v31 = vld [vmem:[#allocation2 + $0x120] sm:$0xff]  ;;  %v99_v32 = vld [vmem:[#allocation2 + $0x128] sm:$0xff]  ;;  %926 = vmatpush3.bf16.msra.mxu0 %v925_v17  ;;  %v959_v34 = vpack.c.bf16 %v115_v30, %v114_v29  ;;  %v85_v36 = vld [vmem:[#allocation2 + $0xb8] sm:$0xff] }
  0x2e   :  { %v68_v37 = vld [vmem:[#allocation2 + $0x30] sm:$0xff]  ;;  %928 = vmatprep.subr.bf16.mxu0 %v927_v26  ;;  %v961_v38 = vpack.c.bf16 %v99_v32, %v98_v31  ;;  %v931_v39 = vpack.c.bf16 %v85_v36, %v84_v35  ;;  %v69_v40 = vld [vmem:[#allocation2 + $0x38] sm:$0xff]  ;;  %v86_v46 = vld [vmem:[#allocation2 + $0xc0] sm:$0xff] }
  0x2f   :  { %958 = vmatpush3.bf16.msra.mxu1 %v957_v25  ;;  %v116_v41 = vld [vmem:[#allocation2 + $0x1b0] sm:$0xff]  ;;  %v117_v42 = vld [vmem:[#allocation2 + $0x1b8] sm:$0xff]  ;;  %v87_v47 = vld [vmem:[#allocation2 + $0xc8] sm:$0xff]  ;;  %v933_v48 = vpack.c.bf16 %v69_v40, %v68_v37 }
  0x30   :  { %960 = vmatprep.subr.bf16.mxu1 %v959_v34  ;;  %v963_v43 = vpack.c.bf16 %v117_v42, %v116_v41  ;;  %v100_v44 = vld [vmem:[#allocation2 + $0x130] sm:$0xff]  ;;  %v101_v45 = vld [vmem:[#allocation2 + $0x138] sm:$0xff]  ;;  %v118_v49 = vld [vmem:[#allocation2 + $0x1c0] sm:$0xff]  ;;  %v935_v52 = vpack.c.bf16 %v87_v47, %v86_v46 }
  0x31   :  { %930 = vmatpush3.bf16.msra.mxu0 %v929_v33  ;;  %v119_v50 = vld [vmem:[#allocation2 + $0x1c8] sm:$0xff]  ;;  %v965_v51 = vpack.c.bf16 %v101_v45, %v100_v44  ;;  %v70_v53 = vld [vmem:[#allocation2 + $0x40] sm:$0xff]  ;;  %v88_v58 = vld [vmem:[#allocation2 + $0xd0] sm:$0xff] }
  0x32   :  { %932 = vmatprep.subr.bf16.mxu0 %v931_v39  ;;  %v71_v54 = vld [vmem:[#allocation2 + $0x48] sm:$0xff]  ;;  %v102_v55 = vld [vmem:[#allocation2 + $0x140] sm:$0xff]  ;;  %v967_v56 = vpack.c.bf16 %v119_v50, %v118_v49  ;;  %v89_v59 = vld [vmem:[#allocation2 + $0xd8] sm:$0xff] }
  0x33   :  { %962 = vmatpush3.bf16.msra.mxu1 %v961_v38  ;;  %v103_v57 = vld [vmem:[#allocation2 + $0x148] sm:$0xff]  ;;  %v120_v60 = vld [vmem:[#allocation2 + $0x1d0] sm:$0xff]  ;;  %v121_v61 = vld [vmem:[#allocation2 + $0x1d8] sm:$0xff]  ;;  %v937_v62 = vpack.c.bf16 %v71_v54, %v70_v53  ;;  %v939_v0 = vpack.c.bf16 %v89_v59, %v88_v58 }
  0x34   :  { %964 = vmatprep.subr.bf16.mxu1 %v963_v43  ;;  %v969_v63 = vpack.c.bf16 %v103_v57, %v102_v55  ;;  %v72_v1 = vld [vmem:[#allocation2 + $0x50] sm:$0xff]  ;;  %v73_v2 = vld [vmem:[#allocation2 + $0x58] sm:$0xff]  ;;  %v971_v4 = vpack.c.bf16 %v121_v61, %v120_v60  ;;  %v90_v6 = vld [vmem:[#allocation2 + $0xe0] sm:$0xff] }
  0x35   :  { %934 = vmatpush3.bf16.msra.mxu0 %v933_v48  ;;  %v104_v3 = vld [vmem:[#allocation2 + $0x150] sm:$0xff]  ;;  %v105_v5 = vld [vmem:[#allocation2 + $0x158] sm:$0xff]  ;;  %v91_v7 = vld [vmem:[#allocation2 + $0xe8] sm:$0xff]  ;;  %v941_v10 = vpack.c.bf16 %v73_v2, %v72_v1 }
  0x36   :  { %936 = vmatprep.subr.bf16.mxu0 %v935_v52  ;;  %v122_v8 = vld [vmem:[#allocation2 + $0x1e0] sm:$0xff]  ;;  %v123_v9 = vld [vmem:[#allocation2 + $0x1e8] sm:$0xff]  ;;  %v973_v13 = vpack.c.bf16 %v105_v5, %v104_v3  ;;  %v943_v14 = vpack.c.bf16 %v91_v7, %v90_v6  ;;  %v92_v19 = vld [vmem:[#allocation2 + $0xf0] sm:$0xff] }
  0x37   :  { %966 = vmatpush3.bf16.msra.mxu1 %v965_v51  ;;  %v74_v11 = vld [vmem:[#allocation2 + $0x60] sm:$0xff]  ;;  %v75_v12 = vld [vmem:[#allocation2 + $0x68] sm:$0xff]  ;;  %v975_v18 = vpack.c.bf16 %v123_v9, %v122_v8  ;;  %v93_v20 = vld [vmem:[#allocation2 + $0xf8] sm:$0xff] }
  0x38   :  { %968 = vmatprep.subr.bf16.mxu1 %v967_v56  ;;  %v106_v15 = vld [vmem:[#allocation2 + $0x160] sm:$0xff]  ;;  %v107_v16 = vld [vmem:[#allocation2 + $0x168] sm:$0xff]  ;;  %v57_v21 = vld [vmem:[%s1321_s0 + $0x18] sm:$0xff]  ;;  %v945_v24 = vpack.c.bf16 %v75_v12, %v74_v11  ;;  %v947_v26 = vpack.c.bf16 %v93_v20, %v92_v19 }
  0x39   :  { %938 = vmatpush3.bf16.msra.mxu0 %v937_v62  ;;  %v55_v17 = vld [vmem:[%s1321_s0 + $0x8] sm:$0xff]  ;;  %v124_v22 = vld [vmem:[#allocation2 + $0x1f0] sm:$0xff]  ;;  %v125_v23 = vld [vmem:[#allocation2 + $0x1f8] sm:$0xff]  ;;  %331 = vmatprep.mubr.f32.mxu1 %v57_v21  ;;  %v977_v25 = vpack.c.bf16 %v107_v16, %v106_v15 }
  0x3a   :  { %940 = vmatprep.subr.bf16.mxu0 %v939_v0  ;;  %261 = vmatprep.mubr.f32.mxu0 %v55_v17  ;;  %v76_v27 = vld [vmem:[#allocation2 + $0x70] sm:$0xff]  ;;  %v77_v28 = vld [vmem:[#allocation2 + $0x78] sm:$0xff]  ;;  %v979_v30 = vpack.c.bf16 %v125_v23, %v124_v22  ;;  %v142_v32 = vld [vmem:[#allocation2 + $0x280] sm:$0xff] }
  0x3b   :  { %970 = vmatpush3.bf16.msra.mxu1 %v969_v63  ;;  %v108_v29 = vld [vmem:[#allocation2 + $0x170] sm:$0xff]  ;;  %v109_v31 = vld [vmem:[#allocation2 + $0x178] sm:$0xff]  ;;  %v143_v33 = vld [vmem:[#allocation2 + $0x288] sm:$0xff]  ;;  %v949_v36 = vpack.c.bf16 %v77_v28, %v76_v27 }
  0x3c   :  { %972 = vmatprep.subr.bf16.mxu1 %v971_v4  ;;  %v174_v34 = vld [vmem:[#allocation2 + $0x380] sm:$0xff]  ;;  %v175_v35 = vld [vmem:[#allocation2 + $0x388] sm:$0xff]  ;;  %v981_v37 = vpack.c.bf16 %v109_v31, %v108_v29  ;;  %v983_v38 = vpack.c.bf16 %v143_v33, %v142_v32  ;;  %v144_v44 = vld [vmem:[#allocation2 + $0x290] sm:$0xff] }
  0x3d   :  { %942 = vmatpush3.bf16.msra.mxu0 %v941_v10  ;;  %v126_v39 = vld [vmem:[#allocation2 + $0x200] sm:$0xff]  ;;  %v127_v40 = vld [vmem:[#allocation2 + $0x208] sm:$0xff]  ;;  %v1015_v42 = vpack.c.bf16 %v175_v35, %v174_v34  ;;  %v145_v45 = vld [vmem:[#allocation2 + $0x298] sm:$0xff] }
  0x3e   :  { %944 = vmatprep.subr.bf16.mxu0 %v943_v14  ;;  %v158_v41 = vld [vmem:[#allocation2 + $0x300] sm:$0xff]  ;;  %v159_v43 = vld [vmem:[#allocation2 + $0x308] sm:$0xff]  ;;  %v176_v46 = vld [vmem:[#allocation2 + $0x390] sm:$0xff]  ;;  %v985_v49 = vpack.c.bf16 %v127_v40, %v126_v39  ;;  %v987_v52 = vpack.c.bf16 %v145_v45, %v144_v44 }
  0x3f   :  { %974 = vmatpush3.bf16.msra.mxu1 %v973_v13  ;;  %v177_v47 = vld [vmem:[#allocation2 + $0x398] sm:$0xff]  ;;  %v54_v48 = vld [vmem:[%s1321_s0] sm:$0xff]  ;;  %v56_v50 = vld [vmem:[%s1321_s0 + $0x10] sm:$0xff]  ;;  %v1017_v51 = vpack.c.bf16 %v159_v43, %v158_v41 }
  0x40   :  { %976 = vmatprep.subr.bf16.mxu1 %v975_v18  ;;  %v128_v53 = vld [vmem:[#allocation2 + $0x210] sm:$0xff]  ;;  %v129_v54 = vld [vmem:[#allocation2 + $0x218] sm:$0xff]  ;;  %v1019_v56 = vpack.c.bf16 %v177_v47, %v176_v46  ;;  %v146_v58 = vld [vmem:[#allocation2 + $0x2a0] sm:$0xff] }
  0x41   :  { %946 = vmatpush3.bf16.msra.mxu0 %v945_v24  ;;  %v160_v55 = vld [vmem:[#allocation2 + $0x310] sm:$0xff]  ;;  %v161_v57 = vld [vmem:[#allocation2 + $0x318] sm:$0xff]  ;;  %v147_v59 = vld [vmem:[#allocation2 + $0x2a8] sm:$0xff]  ;;  %v989_v62 = vpack.c.bf16 %v129_v54, %v128_v53 }
  0x42   :  { %948 = vmatprep.subr.bf16.mxu0 %v947_v26  ;;  %v178_v60 = vld [vmem:[#allocation2 + $0x3a0] sm:$0xff]  ;;  %v179_v61 = vld [vmem:[#allocation2 + $0x3a8] sm:$0xff]  ;;  %v1021_v63 = vpack.c.bf16 %v161_v57, %v160_v55  ;;  %v991_v0 = vpack.c.bf16 %v147_v59, %v146_v58  ;;  %v148_v6 = vld [vmem:[#allocation2 + $0x2b0] sm:$0xff] }
  0x43   :  { %978 = vmatpush3.bf16.msra.mxu1 %v977_v25  ;;  %v130_v1 = vld [vmem:[#allocation2 + $0x220] sm:$0xff]  ;;  %v131_v2 = vld [vmem:[#allocation2 + $0x228] sm:$0xff]  ;;  %v1023_v4 = vpack.c.bf16 %v179_v61, %v178_v60  ;;  %v149_v7 = vld [vmem:[#allocation2 + $0x2b8] sm:$0xff] }
  0x44   :  { %980 = vmatprep.subr.bf16.mxu1 %v979_v30  ;;  %v162_v3 = vld [vmem:[#allocation2 + $0x320] sm:$0xff]  ;;  %v163_v5 = vld [vmem:[#allocation2 + $0x328] sm:$0xff]  ;;  %v180_v8 = vld [vmem:[#allocation2 + $0x3b0] sm:$0xff]  ;;  %v993_v10 = vpack.c.bf16 %v131_v2, %v130_v1  ;;  %v995_v12 = vpack.c.bf16 %v149_v7, %v148_v6 }
  0x45   :  { %950 = vmatpush3.bf16.msra.mxu0 %v949_v36  ;;  %v181_v9 = vld [vmem:[#allocation2 + $0x3b8] sm:$0xff]  ;;  %v1025_v11 = vpack.c.bf16 %v163_v5, %v162_v3  ;;  %v132_v13 = vld [vmem:[#allocation2 + $0x230] sm:$0xff]  ;;  %v150_v18 = vld [vmem:[#allocation2 + $0x2c0] sm:$0xff] }
  0x46   :  { %984 = vmatprep.subr.bf16.mxu0 %v983_v38  ;;  %v133_v14 = vld [vmem:[#allocation2 + $0x238] sm:$0xff]  ;;  %v164_v15 = vld [vmem:[#allocation2 + $0x330] sm:$0xff]  ;;  %v1027_v16 = vpack.c.bf16 %v181_v9, %v180_v8  ;;  %v151_v19 = vld [vmem:[#allocation2 + $0x2c8] sm:$0xff] }
  0x47   :  { %982 = vmatpush3.bf16.msra.mxu1 %v981_v37  ;;  %v165_v17 = vld [vmem:[#allocation2 + $0x338] sm:$0xff]  ;;  %v182_v20 = vld [vmem:[#allocation2 + $0x3c0] sm:$0xff]  ;;  %v183_v21 = vld [vmem:[#allocation2 + $0x3c8] sm:$0xff]  ;;  %v997_v22 = vpack.c.bf16 %v133_v14, %v132_v13  ;;  %v999_v26 = vpack.c.bf16 %v151_v19, %v150_v18 }
  0x48   :  { %1016 = vmatprep.subr.bf16.mxu1 %v1015_v42  ;;  %262 = vmatmul.mubr.f32.vlgmr.msra.gmra.mrb[0].mxu0 %v54_v48  ;;  %v59_v23 = vld [vmem:[%s1321_s0 + $0x28] sm:$0xff]  ;;  %v61_v24 = vld [vmem:[%s1321_s0 + $0x38] sm:$0xff]  ;;  %v1029_v25 = vpack.c.bf16 %v165_v17, %v164_v15  ;;  %v134_v27 = vld [vmem:[#allocation2 + $0x240] sm:$0xff]  ;;  %v1031_v30 = vpack.c.bf16 %v183_v21, %v182_v20 }
  0x49   :  { %986 = vmatpush3.bf16.msra.mxu0 %v985_v49  ;;  %v135_v28 = vld [vmem:[#allocation2 + $0x248] sm:$0xff]  ;;  %v166_v29 = vld [vmem:[#allocation2 + $0x340] sm:$0xff]  ;;  %v152_v32 = vld [vmem:[#allocation2 + $0x2d0] sm:$0xff]  ;;  %401 = vmatprep.mubr.f32.mxu0 %v59_v23 }
  0x4a   :  { %332 = vmatmul.mubr.f32.vlgmr.msra.gmra.mrb[0].mxu1 %v56_v50  ;;  %988 = vmatprep.subr.bf16.mxu0 %v987_v52  ;;  %v167_v31 = vld [vmem:[#allocation2 + $0x348] sm:$0xff]  ;;  %v153_v33 = vld [vmem:[#allocation2 + $0x2d8] sm:$0xff]  ;;  %v184_v34 = vld [vmem:[#allocation2 + $0x3d0] sm:$0xff]  ;;  %v1001_v36 = vpack.c.bf16 %v135_v28, %v134_v27 }
  0x4b   :  { %1018 = vmatpush3.bf16.msra.mxu1 %v1017_v51  ;;  %v185_v35 = vld [vmem:[#allocation2 + $0x3d8] sm:$0xff]  ;;  %471 = vmatprep.mubr.f32.mxu1 %v61_v24  ;;  %v1033_v37 = vpack.c.bf16 %v167_v31, %v166_v29  ;;  %v1003_v38 = vpack.c.bf16 %v153_v33, %v152_v32  ;;  %v136_v39 = vld [vmem:[#allocation2 + $0x250] sm:$0xff]  ;;  %v154_v44 = vld [vmem:[#allocation2 + $0x2e0] sm:$0xff]  ;;  %v1156_v33 = vmov 0.0  }
  0x4c   :  { %1020 = vmatprep.subr.bf16.mxu1 %v1019_v56  ;;  %v137_v40 = vld [vmem:[#allocation2 + $0x258] sm:$0xff]  ;;  %v168_v41 = vld [vmem:[#allocation2 + $0x350] sm:$0xff]  ;;  %v1035_v42 = vpack.c.bf16 %v185_v35, %v184_v34  ;;  %v155_v45 = vld [vmem:[#allocation2 + $0x2e8] sm:$0xff] }
  0x4d   :  { %990 = vmatpush3.bf16.msra.mxu0 %v989_v62  ;;  %v169_v43 = vld [vmem:[#allocation2 + $0x358] sm:$0xff]  ;;  %v186_v46 = vld [vmem:[#allocation2 + $0x3e0] sm:$0xff]  ;;  %v187_v47 = vld [vmem:[#allocation2 + $0x3e8] sm:$0xff]  ;;  %v1005_v48 = vpack.c.bf16 %v137_v40, %v136_v39  ;;  %v1007_v50 = vpack.c.bf16 %v155_v45, %v154_v44 }
  0x4e   :  { %992 = vmatprep.subr.bf16.mxu0 %v991_v0  ;;  %v1037_v49 = vpack.c.bf16 %v169_v43, %v168_v41  ;;  %v138_v51 = vld [vmem:[#allocation2 + $0x260] sm:$0xff]  ;;  %v139_v52 = vld [vmem:[#allocation2 + $0x268] sm:$0xff]  ;;  %v1039_v54 = vpack.c.bf16 %v187_v47, %v186_v46  ;;  %v156_v56 = vld [vmem:[#allocation2 + $0x2f0] sm:$0xff] }
  0x4f   :  { %1022 = vmatpush3.bf16.msra.mxu1 %v1021_v63  ;;  %v170_v53 = vld [vmem:[#allocation2 + $0x360] sm:$0xff]  ;;  %v171_v55 = vld [vmem:[#allocation2 + $0x368] sm:$0xff]  ;;  %v157_v57 = vld [vmem:[#allocation2 + $0x2f8] sm:$0xff]  ;;  %v1009_v60 = vpack.c.bf16 %v139_v52, %v138_v51 }
  0x50   :  { %1024 = vmatprep.subr.bf16.mxu1 %v1023_v4  ;;  %v188_v58 = vld [vmem:[#allocation2 + $0x3f0] sm:$0xff]  ;;  %v189_v59 = vld [vmem:[#allocation2 + $0x3f8] sm:$0xff]  ;;  %v1041_v61 = vpack.c.bf16 %v171_v55, %v170_v53  ;;  %v1011_v62 = vpack.c.bf16 %v157_v57, %v156_v56  ;;  %v58_v6 = vld [vmem:[%s1321_s0 + $0x20] sm:$0xff] }
  0x51   :  { %994 = vmatpush3.bf16.msra.mxu0 %v993_v10  ;;  %v140_v63 = vld [vmem:[#allocation2 + $0x270] sm:$0xff]  ;;  %v141_v0 = vld [vmem:[#allocation2 + $0x278] sm:$0xff]  ;;  %v1043_v1 = vpack.c.bf16 %v189_v59, %v188_v58  ;;  %v478_v8 = vld [vmem:[%s1324_s3] sm:$0xff] }
  0x52   :  { %996 = vmatprep.subr.bf16.mxu0 %v995_v12  ;;  %v172_v2 = vld [vmem:[#allocation2 + $0x370] sm:$0xff]  ;;  %v173_v3 = vld [vmem:[#allocation2 + $0x378] sm:$0xff]  ;;  %v1013_v4 = vpack.c.bf16 %v141_v0, %v140_v63  ;;  %v479_v9 = vld [vmem:[%s1324_s3 + $0x8] sm:$0xff] }
  0x53   :  { %1026 = vmatpush3.bf16.msra.mxu1 %v1025_v11  ;;  %v1045_v5 = vpack.c.bf16 %v173_v3, %v172_v2  ;;  %v60_v7 = vld [vmem:[%s1321_s0 + $0x30] sm:$0xff]  ;;  %v1154_v11 = vmov 0.0|0.0   ;;  %v1048_v12 = vpack.c.bf16 %v479_v9, %v478_v8  ;;  %v481_v13 = vld [vmem:[%s1324_s3 + $0x18] sm:$0xff]  ;;  %v482_v15 = vld [vmem:[%s1324_s3 + $0x20] sm:$0xff] }
  0x54   :  { %1028 = vmatprep.subr.bf16.mxu1 %v1027_v16  ;;  %v480_v10 = vld [vmem:[%s1324_s3 + $0x10] sm:$0xff]  ;;  %v483_v16 = vld [vmem:[%s1324_s3 + $0x28] sm:$0xff]  ;;  %v485_v19 = vld [vmem:[%s1324_s3 + $0x38] sm:$0xff] }
  0x55   :  { %998 = vmatpush3.bf16.msra.mxu0 %v997_v22  ;;  %v1051_v14 = vpack.c.bf16 %v481_v13, %v480_v10  ;;  %v1054_v17 = vpack.c.bf16 %v483_v16, %v482_v15  ;;  %v484_v18 = vld [vmem:[%s1324_s3 + $0x30] sm:$0xff]  ;;  %v486_v21 = vld [vmem:[%s1324_s3 + $0x40] sm:$0xff]  ;;  %v487_v22 = vld [vmem:[%s1324_s3 + $0x48] sm:$0xff] }
  0x56   :  { %1000 = vmatprep.subr.bf16.mxu0 %v999_v26  ;;  %v1057_v20 = vpack.c.bf16 %v485_v19, %v484_v18  ;;  %v1060_v23 = vpack.c.bf16 %v487_v22, %v486_v21  ;;  %v488_v24 = vld [vmem:[%s1324_s3 + $0x50] sm:$0xff]  ;;  %v490_v27 = vld [vmem:[%s1324_s3 + $0x60] sm:$0xff]  ;;  %v491_v28 = vld [vmem:[%s1324_s3 + $0x68] sm:$0xff] }
  0x57   :  { %1030 = vmatpush3.bf16.msra.mxu1 %v1029_v25  ;;  %v489_v25 = vld [vmem:[%s1324_s3 + $0x58] sm:$0xff]  ;;  %v1066_v29 = vpack.c.bf16 %v491_v28, %v490_v27  ;;  %v572_v34 = vld [vmem:[#allocation4] sm:$0xff]  ;;  %v573_v35 = vld [vmem:[#allocation4 + $0x8] sm:$0xff] }
  0x58   :  { %1032 = vmatprep.subr.bf16.mxu1 %v1031_v30  ;;  %v1063_v26 = vpack.c.bf16 %v489_v25, %v488_v24  ;;  %v492_v30 = vld [vmem:[%s1324_s3 + $0x70] sm:$0xff]  ;;  %v493_v31 = vld [vmem:[%s1324_s3 + $0x78] sm:$0xff]  ;;  %v576_v40 = vld [vmem:[#allocation4 + $0x20] sm:$0xff] }
  0x59   :  { %1002 = vmatpush3.bf16.msra.mxu0 %v1001_v36  ;;  %v1069_v32 = vpack.c.bf16 %v493_v31, %v492_v30  ;;  %v574_v36 = vld [vmem:[#allocation4 + $0x10] sm:$0xff]  ;;  %v577_v41 = vld [vmem:[#allocation4 + $0x28] sm:$0xff]  ;;  %v579_v44 = vld [vmem:[#allocation4 + $0x38] sm:$0xff] }
  0x5a   :  { %1004 = vmatprep.subr.bf16.mxu0 %v1003_v38  ;;  %v575_v38 = vld [vmem:[#allocation4 + $0x18] sm:$0xff]  ;;  %v578_v43 = vld [vmem:[#allocation4 + $0x30] sm:$0xff]  ;;  %v580_v46 = vld [vmem:[#allocation4 + $0x40] sm:$0xff] }
  0x5b   :  { %1034 = vmatpush3.bf16.msra.mxu1 %v1033_v37  ;;  %v1072_v37 = vpack.c.bf16 %v573_v35, %v572_v34  ;;  %v1075_v39 = vpack.c.bf16 %v575_v38, %v574_v36  ;;  %v1081_v45 = vpack.c.bf16 %v579_v44, %v578_v43  ;;  %v581_v47 = vld [vmem:[#allocation4 + $0x48] sm:$0xff]  ;;  %v584_v52 = vld [vmem:[#allocation4 + $0x60] sm:$0xff]  ;;  %v586_v9 = vld [vmem:[#allocation4 + $0x70] sm:$0xff] }
  0x5c   :  { %1036 = vmatprep.subr.bf16.mxu1 %v1035_v42  ;;  %v1078_v42 = vpack.c.bf16 %v577_v41, %v576_v40  ;;  %v585_v53 = vld [vmem:[#allocation4 + $0x68] sm:$0xff]  ;;  %v672_v56 = vld [vmem:[%s1323_s2] ss:$0 sm:$0xff]  ;;  %v587_v10 = vld [vmem:[#allocation4 + $0x78] sm:$0xff] }
  0x5d   :  { %1006 = vmatpush3.bf16.msra.mxu0 %v1005_v48  ;;  %v1084_v48 = vpack.c.bf16 %v581_v47, %v580_v46 }
  0x5e   :  { %1008 = vmatprep.subr.bf16.mxu0 %v1007_v50  ;;  %v583_v50 = vld [vmem:[#allocation4 + $0x58] sm:$0xff] }
  0x5f   :  { %1038 = vmatpush3.bf16.msra.mxu1 %v1037_v49  ;;  %v582_v49 = vld [vmem:[#allocation4 + $0x50] sm:$0xff] }
  0x60   :  { %1040 = vmatprep.subr.bf16.mxu1 %v1039_v54  ;;  %v1087_v51 = vpack.c.bf16 %v583_v50, %v582_v49  ;;  %v1090_v54 = vpack.c.bf16 %v585_v53, %v584_v52 }
  0x61   :  { %1010 = vmatpush3.bf16.msra.mxu0 %v1009_v60 }
  0x62   :  { %1012 = vmatprep.subr.bf16.mxu0 %v1011_v62 }
  0x63   :  { %1042 = vmatpush3.bf16.msra.mxu1 %v1041_v61 }
  0x64   :  { %1044 = vmatprep.subr.bf16.mxu1 %v1043_v1 }
  0x65   :  { %1014 = vmatpush3.bf16.msra.mxu0 %v1013_v4 }
  0x66   :  { %1047 = vmatprep.subr.bf16.mxu0 %v1154_v11 }
  0x67   :  { %1046 = vmatpush3.bf16.msra.mxu1 %v1045_v5 }
  0x68   :  { %402 = vmatmul.mubr.f32.vlgmr.msra.gmra.mrb[2].mxu0 %v58_v6  ;;  %1071 = vmatprep.subr.bf16.mxu1 %v1154_v11 }
  0x69   :  { %1049 = vmatpush3.bf16.msra.mxu0 %v1048_v12  ;;  %881 = vmatprep.mubr.msk.f32.mxu0 %vm1155_vm0, %v1156_v33  ;;  %v673_v12 = vld [vmem:[%s1325_s4] ss:$0 sm:$0xff] }
  0x6a   :  { %472 = vmatmul.mubr.f32.vlgmr.msra.gmra.mrb[2].mxu1 %v60_v7  ;;  %1050 = vmatprep.subr.bf16.mxu0 %v1154_v11 }
  0x6b   :  { %916 = vmatprep.mubr.msk.f32.mxu1 %vm1155_vm0, %v1156_v33  ;;  %1073 = vmatpush3.bf16.msra.mxu1 %v1072_v37 }
  0x6c   :  { %1074 = vmatprep.subr.bf16.mxu1 %v1154_v11 }
  0x6d   :  { %1052 = vmatpush3.bf16.msra.mxu0 %v1051_v14 }
  0x6e   :  { %1053 = vmatprep.subr.bf16.mxu0 %v1154_v11 }
  0x6f   :  { %1076 = vmatpush3.bf16.msra.mxu1 %v1075_v39 }
  0x70   :  { %1077 = vmatprep.subr.bf16.mxu1 %v1154_v11 }
  0x71   :  { %1055 = vmatpush3.bf16.msra.mxu0 %v1054_v17  ;;  %v674_v17 = vld [vmem:[%s1327_s6] ss:$0 sm:$0xff] }
  0x72   :  { %1056 = vmatprep.subr.bf16.mxu0 %v1154_v11 }
  0x73   :  { %1079 = vmatpush3.bf16.msra.mxu1 %v1078_v42 }
  0x74   :  { %1080 = vmatprep.subr.bf16.mxu1 %v1154_v11 }
  0x75   :  { %1058 = vmatpush3.bf16.msra.mxu0 %v1057_v20 }
  0x76   :  { %1059 = vmatprep.subr.bf16.mxu0 %v1154_v11 }
  0x77   :  { %1082 = vmatpush3.bf16.msra.mxu1 %v1081_v45 }
  0x78   :  { %1083 = vmatprep.subr.bf16.mxu1 %v1154_v11 }
  0x79   :  { %1061 = vmatpush3.bf16.msra.mxu0 %v1060_v23 }
  0x7a   :  { %1062 = vmatprep.subr.bf16.mxu0 %v1154_v11 }
  0x7b   :  { %1085 = vmatpush3.bf16.msra.mxu1 %v1084_v48 }
  0x7c   :  { %1086 = vmatprep.subr.bf16.mxu1 %v1154_v11 }
  0x7d   :  { %1064 = vmatpush3.bf16.msra.mxu0 %v1063_v26 }
  0x7e   :  { %1065 = vmatprep.subr.bf16.mxu0 %v1154_v11 }
  0x7f   :  { %1088 = vmatpush3.bf16.msra.mxu1 %v1087_v51 }
  0x80   :  { %1089 = vmatprep.subr.bf16.mxu1 %v1154_v11 }
  0x81   :  { %1067 = vmatpush3.bf16.msra.mxu0 %v1066_v29 }
  0x82   :  { %1068 = vmatprep.subr.bf16.mxu0 %v1154_v11 }
  0x83   :  { %1091 = vmatpush3.bf16.msra.mxu1 %v1090_v54 }
  0x84   :  { %1092 = vmatprep.subr.bf16.mxu1 %v1154_v11  ;;  %v1093_v11 = vpack.c.bf16 %v587_v10, %v586_v9 }
  0x85   :  { %1070 = vmatpush3.bf16.msra.mxu0 %v1069_v32 }
  0x87   :  { %1094 = vmatpush3.bf16.msra.mxu1 %v1093_v11 }
 0x11b   :  { %v707_v55 = vpop.f32.mrb[0].mxu0 }
 0x11c   :  { %v708_v57 = vpop.f32.mrb[1].mxu0 }
 0x11d   :  { %v742_v58 = vpop.f32.mrb[0].mxu1  ;;  %v709_v59 = vadd.f32 %v708_v57, %v707_v55 }
 0x11e   :  { %v743_v60 = vpop.f32.mrb[1].mxu1 }
 0x11f   :  { %v744_v61 = vadd.f32 %v743_v60, %v742_v58  ;;  %v264_v62 = vadd.f32 %v709_v59, %v672_v56 }
 0x121   :  { %v334_v63 = vadd.f32 %v744_v61, %v264_v62 }
 0x13b   :  { %v777_v0 = vpop.f32.mrb[2].mxu0 }
 0x13c   :  { %v778_v1 = vpop.f32.mrb[3].mxu0 }
 0x13d   :  { %v812_v2 = vpop.f32.mrb[2].mxu1  ;;  %v779_v3 = vadd.f32 %v778_v1, %v777_v0 }
 0x13e   :  { %v813_v4 = vpop.f32.mrb[3].mxu1 }
 0x13f   :  { %v814_v5 = vadd.f32 %v813_v4, %v812_v2  ;;  %v404_v6 = vadd.f32 %v779_v3, %v334_v63 }
 0x141   :  { %v474_v7 = vadd.f32 %v814_v5, %v404_v6 }
 0x143   :  { %v477_v8 = vmax.f32 %v474_v7, 0.0 }
 0x145   :  { %882 = vmatmul.mubr.f32.vlgmr.msra.gmra.mrb[4].mxu0 %v477_v8 }
 0x218   :  { %v567_v13 = vpop.f32.mrb[4].mxu0 }
 0x219   :  { %v568_v14 = vadd.f32 %v673_v12, %v567_v13  ;;  %v883_v15 = vpop.f32.mrb[5].mxu0 }
 0x21b   :  { %v571_v16 = vmax.f32 %v568_v14, 0.0 }
 0x21d   :  { %917 = vmatmul.mubr.f32.vlgmr.msra.gmra.mrb[4].mxu1 %v571_v16 }
 0x2f0   :  { %v661_v18 = vpop.f32.mrb[4].mxu1 }
 0x2f1   :  { %v662_v19 = vadd.f32 %v674_v17, %v661_v18  ;;  %v918_v20 = vpop.f32.mrb[5].mxu1 }
 0x2f3   :  { %665 = vst [vmem:[%s1328_s7] sm:$0xff] %v662_v19 }
 0x2f4   :  { %670 = vsyncpa [#allocation3], 1 }
 0x2f5   :  { %671 = vsyncpa [#allocation5], 1 }

</bundles_post_ra>
